<compile_context>
chip_gen: v6e
topology: v6e:2x2x1
jax: 0.10.0
libtpu: 0.0.40
codegen_flags: <defaults>
</compile_context>

<pallas_src>
import jax
import jax.numpy as jnp
from jax import lax
from jax.experimental import pallas as pl
from jax.experimental.pallas import tpu as pltpu

KH = KW = 3  # kernel_size=3, stride=1, padding=1, dilation=1


def _make_sepconv_kernel(H, W, Cin, Cout):
    P = H * W

    # Static tap table: (tap index, dh, dw, lane-roll amount) for the 9 depthwise taps.
    taps = []
    for kh in range(KH):
        for kw in range(KW):
            dh, dw = kh - 1, kw - 1
            off = dh * W + dw                   # flat-index offset of this tap
            taps.append((kh * KW + kw, dh, dw, (-off) % P))

    def kernel(x_ref, hw_ref, wdw_ref, b1_ref, wpw_ref, b2_ref, o_ref):
        """One batch element.

        x_ref  : (1, Cin, P)  f32 VMEM   flattened NCHW input
        hw_ref : (2, P)       i32 VMEM   row 0 = h index, row 1 = w index per flat position
        wdw_ref: (9, Cin, 1)  f32 VMEM   depthwise weights, BN1 scale folded in
        b1_ref : (Cin, 1)     f32 VMEM   BN1 folded bias
        wpw_ref: (Cin, Cout)  f32 SMEM   pointwise weights, BN2 scale folded in
        b2_ref : (Cout,)      f32 SMEM   BN2 folded bias
        o_ref  : (1, Cout, P) f32 VMEM   flattened NCHW output
        """
        x = x_ref[0]                       # (Cin, P)
        h_idx = hw_ref[0:1, :]             # (1, P)
        w_idx = hw_ref[1:2, :]             # (1, P)

        # ---- depthwise 3x3 with zero padding via masks; start from the unshifted center tap.
        acc = x * wdw_ref[KH * KW // 2]    # (Cin, P) * (Cin, 1)
        for tap, dh, dw, shift in taps:
            if dh == 0 and dw == 0:
                continue
            shifted = pltpu.roll(x, shift, 1)          # XLU lane rotation (no slice copies)
            valid = None
            if dh == -1:
                valid = h_idx >= 1
            elif dh == 1:
                valid = h_idx <= H - 2
            if dw == -1:
                m = w_idx >= 1
                valid = m if valid is None else valid & m
            elif dw == 1:
                m = w_idx <= W - 2
                valid = m if valid is None else valid & m
            contrib = shifted * wdw_ref[tap]           # (Cin, P) * (Cin, 1)
            acc = acc + jnp.where(valid, contrib, 0.0)

        # ---- BN1 bias + ReLU (scale already folded into wdw).
        y = jnp.maximum(acc + b1_ref[...], 0.0)        # (Cin, P)

        # ---- pointwise 1x1 conv as Cout x Cin VPU broadcast-MACs (MXU bypassed: K, N tiny).
        y_rows = [y[c:c + 1, :] for c in range(Cin)]   # Cin x (1, P)
        outs = []
        for o in range(Cout):
            z = y_rows[0] * wpw_ref[0, o]
            for c in range(1, Cin):
                z = z + y_rows[c] * wpw_ref[c, o]
            outs.append(jnp.maximum(z + b2_ref[o], 0.0))   # BN2 bias + ReLU
        o_ref[0] = jnp.concatenate(outs, axis=0).astype(o_ref.dtype)   # lane-dense store

    return kernel


def separable_conv2d(x_nchw, w_dw, w_pw,
                     bn1_gamma, bn1_beta, bn1_mean, bn1_var,
                     bn2_gamma, bn2_beta, bn2_mean, bn2_var,
                     eps=1e-5):
    """x_nchw: (N, Cin, H, W) float32 (PyTorch layout). Returns (N, Cout, H, W)."""
    N, Cin, H, W = x_nchw.shape
    Cout = w_pw.shape[0]
    P = H * W

    # Fold eval-mode BN into scale/bias; fold the scales into the conv weights (free on host).
    s1 = bn1_gamma / jnp.sqrt(bn1_var + eps)           # (Cin,)
    b1 = bn1_beta - bn1_mean * s1
    s2 = bn2_gamma / jnp.sqrt(bn2_var + eps)           # (Cout,)
    b2 = bn2_beta - bn2_mean * s2

    # depthwise (Cin,1,KH,KW) -> (KH*KW, Cin, 1), BN1 scale folded per channel.
    wdw = (w_dw[:, 0, :, :] * s1[:, None, None]).astype(jnp.float32)     # (Cin, KH, KW)
    wdw = jnp.transpose(wdw, (1, 2, 0)).reshape(KH * KW, Cin, 1)
    # pointwise (Cout,Cin,1,1) -> (Cin,Cout), BN2 scale folded per output channel.
    wpw = (jnp.transpose(w_pw[:, :, 0, 0], (1, 0)) * s2[None, :]).astype(jnp.float32)

    b1 = b1.reshape(Cin, 1).astype(jnp.float32)
    b2 = b2.astype(jnp.float32)

    # (h, w) index of every flattened spatial position, for in-kernel border masking.
    pos = jnp.arange(P, dtype=jnp.int32)
    hw_idx = jnp.stack([pos // W, pos % W], axis=0)    # (2, P) int32

    # Free reshape (merges contiguous minor dims); no transpose, no pad, no extra HBM pass.
    x_flat = x_nchw.reshape(N, Cin, P).astype(jnp.float32)

    kernel = _make_sepconv_kernel(H, W, Cin, Cout)
    out_flat = pl.pallas_call(
        kernel,
        out_shape=jax.ShapeDtypeStruct((N, Cout, P), jnp.float32),
        grid_spec=pltpu.PrefetchScalarGridSpec(
            num_scalar_prefetch=0,
            grid=(N,),
            in_specs=[
                pl.BlockSpec((1, Cin, P), lambda n: (n, 0, 0)),
                pl.BlockSpec((2, P), lambda n: (0, 0)),
                pl.BlockSpec((KH * KW, Cin, 1), lambda n: (0, 0, 0)),
                pl.BlockSpec((Cin, 1), lambda n: (0, 0)),
                pl.BlockSpec(memory_space=pltpu.MemorySpace.SMEM),
                pl.BlockSpec(memory_space=pltpu.MemorySpace.SMEM),
            ],
            out_specs=pl.BlockSpec((1, Cout, P), lambda n: (n, 0, 0)),
        ),
        compiler_params=pltpu.CompilerParams(
            dimension_semantics=("parallel",),
            vmem_limit_bytes=32 * 1024 * 1024,
        ),
    )(x_flat, hw_idx, wdw, b1, wpw, b2)

    return out_flat.reshape(N, Cout, H, W)   # free reshape back to NCHW


def _reference(x, w_dw, w_pw, g1, bt1, m1, v1, g2, bt2, m2, v2, eps=1e-5):
    """Plain-JAX reference of the PyTorch forward (eval-mode BN)."""
    Cin = x.shape[1]
    y = lax.conv_general_dilated(
        x, w_dw, window_strides=(1, 1), padding=((1, 1), (1, 1)),
        dimension_numbers=("NCHW", "OIHW", "NCHW"), feature_group_count=Cin)
    y = (y - m1[None, :, None, None]) / jnp.sqrt(v1[None, :, None, None] + eps)
    y = y * g1[None, :, None, None] + bt1[None, :, None, None]
    y = jnp.maximum(y, 0.0)
    z = lax.conv_general_dilated(
        y, w_pw, window_strides=(1, 1), padding=((0, 0), (0, 0)),
        dimension_numbers=("NCHW", "OIHW", "NCHW"))
    z = (z - m2[None, :, None, None]) / jnp.sqrt(v2[None, :, None, None] + eps)
    z = z * g2[None, :, None, None] + bt2[None, :, None, None]
    return jnp.maximum(z, 0.0)


if __name__ == "__main__":
    key = jax.random.PRNGKey(0)
    ks = jax.random.split(key, 11)

    N, Cin, Cout, H, W = 2, 4, 8, 16, 16

    x = jax.random.normal(ks[0], (N, Cin, H, W), jnp.float32)
    w_dw = jax.random.normal(ks[1], (Cin, 1, KH, KW), jnp.float32) * 0.2   # groups=Cin
    w_pw = jax.random.normal(ks[2], (Cout, Cin, 1, 1), jnp.float32) * 0.2  # 1x1 conv

    bn1_gamma = 1.0 + 0.1 * jax.random.normal(ks[3], (Cin,), jnp.float32)
    bn1_beta = 0.1 * jax.random.normal(ks[4], (Cin,), jnp.float32)
    bn1_mean = 0.05 * jax.random.normal(ks[5], (Cin,), jnp.float32)
    bn1_var = jnp.abs(jax.random.normal(ks[6], (Cin,), jnp.float32)) + 0.5

    bn2_gamma = 1.0 + 0.1 * jax.random.normal(ks[7], (Cout,), jnp.float32)
    bn2_beta = 0.1 * jax.random.normal(ks[8], (Cout,), jnp.float32)
    bn2_mean = 0.05 * jax.random.normal(ks[9], (Cout,), jnp.float32)
    bn2_var = jnp.abs(jax.random.normal(ks[10], (Cout,), jnp.float32)) + 0.5
    # TODO(synk): training-mode BatchNorm (batch statistics + running-stat updates) is not
    # implemented; eval-mode BN semantics (running stats folded into scale/bias) are used.

    out = separable_conv2d(x, w_dw, w_pw,
                           bn1_gamma, bn1_beta, bn1_mean, bn1_var,
                           bn2_gamma, bn2_beta, bn2_mean, bn2_var)
    out = jax.block_until_ready(out)

    ref = _reference(x, w_dw, w_pw,
                     bn1_gamma, bn1_beta, bn1_mean, bn1_var,
                     bn2_gamma, bn2_beta, bn2_mean, bn2_var)
    assert out.shape == (N, Cout, H, W)
    assert jnp.allclose(out, ref, atol=1e-4, rtol=1e-4), "mismatch vs reference"

    print("KERNEL_OK")
</pallas_src>

<mosaic_0001>
module attributes {stable_mosaic.version = 11 : i64} {
  func.func @kernel(%arg0: i32, %arg1: memref<1x4x256xf32, #tpu.memory_space<vmem>>, %arg2: memref<2x256xi32, #tpu.memory_space<vmem>>, %arg3: memref<9x4x1xf32, #tpu.memory_space<vmem>>, %arg4: memref<4x1xf32, #tpu.memory_space<vmem>>, %arg5: memref<4x8xf32, #tpu.memory_space<smem>>, %arg6: memref<8xf32, #tpu.memory_space<smem>>, %arg7: memref<1x8x256xf32, #tpu.memory_space<vmem>>) attributes {dimension_semantics = [#tpu.dimension_semantics<parallel>], iteration_bounds = array<i64: 2>, scalar_prefetch = 0 : i64, scratch_operands = 0 : i64, tpu.core_type = #tpu.core_type<tc>, window_params = [{transform_indices = @transform_0, window_bounds = array<i64: 1, 4, 256>}, {pipeline_mode = #tpu.pipeline_mode<synchronous>, transform_indices = @transform_1, window_bounds = array<i64: 2, 256>}, {pipeline_mode = #tpu.pipeline_mode<synchronous>, transform_indices = @transform_2, window_bounds = array<i64: 9, 4, 1>}, {pipeline_mode = #tpu.pipeline_mode<synchronous>, transform_indices = @transform_3, window_bounds = array<i64: 4, 1>}, {transform_indices = @transform_4, window_bounds = array<i64: 4, 8>}, {transform_indices = @transform_5, window_bounds = array<i64: 8>}, {transform_indices = @transform_6, window_bounds = array<i64: 1, 8, 256>}]} {
    %c0 = arith.constant 0 : index
    %c0_0 = arith.constant 0 : index
    %c0_1 = arith.constant 0 : index
    %0 = vector.load %arg1[%c0, %c0_0, %c0_1] : memref<1x4x256xf32, #tpu.memory_space<vmem>>, vector<1x4x256xf32>
    %1 = vector.shape_cast %0 : vector<1x4x256xf32> to vector<4x256xf32>
    %c0_2 = arith.constant 0 : index
    %c0_3 = arith.constant 0 : index
    %2 = vector.load %arg2[%c0_2, %c0_3] : memref<2x256xi32, #tpu.memory_space<vmem>>, vector<1x256xi32>
    %c1 = arith.constant 1 : index
    %c0_4 = arith.constant 0 : index
    %3 = vector.load %arg2[%c1, %c0_4] : memref<2x256xi32, #tpu.memory_space<vmem>>, vector<1x256xi32>
    %c4 = arith.constant 4 : index
    %c0_5 = arith.constant 0 : index
    %c0_6 = arith.constant 0 : index
    %4 = vector.load %arg3[%c4, %c0_5, %c0_6] : memref<9x4x1xf32, #tpu.memory_space<vmem>>, vector<1x4x1xf32>
    %5 = vector.shape_cast %4 : vector<1x4x1xf32> to vector<4x1xf32>
    %6 = vector.broadcast %5 : vector<4x1xf32> to vector<4x256xf32>
    %7 = arith.mulf %1, %6 : vector<4x256xf32>
    %c17_i32 = arith.constant 17 : i32
    %8 = tpu.dynamic_rotate %1 by %c17_i32 dim 1 : vector<4x256xf32>, i32 -> vector<4x256xf32>
    %c1_i32 = arith.constant 1 : i32
    %9 = vector.broadcast %c1_i32 : i32 to vector<1x256xi32>
    %10 = arith.cmpi sge, %2, %9 : vector<1x256xi32>
    %c1_i32_7 = arith.constant 1 : i32
    %11 = vector.broadcast %c1_i32_7 : i32 to vector<1x256xi32>
    %12 = arith.cmpi sge, %3, %11 : vector<1x256xi32>
    %13 = arith.andi %10, %12 : vector<1x256xi1>
    %c0_8 = arith.constant 0 : index
    %c0_9 = arith.constant 0 : index
    %c0_10 = arith.constant 0 : index
    %14 = vector.load %arg3[%c0_8, %c0_9, %c0_10] : memref<9x4x1xf32, #tpu.memory_space<vmem>>, vector<1x4x1xf32>
    %15 = vector.shape_cast %14 : vector<1x4x1xf32> to vector<4x1xf32>
    %16 = vector.broadcast %15 : vector<4x1xf32> to vector<4x256xf32>
    %17 = arith.mulf %8, %16 : vector<4x256xf32>
    %cst = arith.constant 0.000000e+00 : f32
    %18 = vector.shape_cast %13 : vector<1x256xi1> to vector<1x256xi1>
    %19 = vector.broadcast %18 : vector<1x256xi1> to vector<4x256xi1>
    %20 = vector.broadcast %cst : f32 to vector<4x256xf32>
    %21 = arith.select %19, %17, %20 : vector<4x256xi1>, vector<4x256xf32>
    %22 = arith.addf %7, %21 : vector<4x256xf32>
    %c16_i32 = arith.constant 16 : i32
    %23 = tpu.dynamic_rotate %1 by %c16_i32 dim 1 : vector<4x256xf32>, i32 -> vector<4x256xf32>
    %c1_i32_11 = arith.constant 1 : i32
    %24 = vector.broadcast %c1_i32_11 : i32 to vector<1x256xi32>
    %25 = arith.cmpi sge, %2, %24 : vector<1x256xi32>
    %c1_12 = arith.constant 1 : index
    %c0_13 = arith.constant 0 : index
    %c0_14 = arith.constant 0 : index
    %26 = vector.load %arg3[%c1_12, %c0_13, %c0_14] : memref<9x4x1xf32, #tpu.memory_space<vmem>>, vector<1x4x1xf32>
    %27 = vector.shape_cast %26 : vector<1x4x1xf32> to vector<4x1xf32>
    %28 = vector.broadcast %27 : vector<4x1xf32> to vector<4x256xf32>
    %29 = arith.mulf %23, %28 : vector<4x256xf32>
    %cst_15 = arith.constant 0.000000e+00 : f32
    %30 = vector.shape_cast %25 : vector<1x256xi1> to vector<1x256xi1>
    %31 = vector.broadcast %30 : vector<1x256xi1> to vector<4x256xi1>
    %32 = vector.broadcast %cst_15 : f32 to vector<4x256xf32>
    %33 = arith.select %31, %29, %32 : vector<4x256xi1>, vector<4x256xf32>
    %34 = arith.addf %22, %33 : vector<4x256xf32>
    %c15_i32 = arith.constant 15 : i32
    %35 = tpu.dynamic_rotate %1 by %c15_i32 dim 1 : vector<4x256xf32>, i32 -> vector<4x256xf32>
    %c1_i32_16 = arith.constant 1 : i32
    %36 = vector.broadcast %c1_i32_16 : i32 to vector<1x256xi32>
    %37 = arith.cmpi sge, %2, %36 : vector<1x256xi32>
    %c14_i32 = arith.constant 14 : i32
    %38 = vector.broadcast %c14_i32 : i32 to vector<1x256xi32>
    %39 = arith.cmpi sle, %3, %38 : vector<1x256xi32>
    %40 = arith.andi %37, %39 : vector<1x256xi1>
    %c2 = arith.constant 2 : index
    %c0_17 = arith.constant 0 : index
    %c0_18 = arith.constant 0 : index
    %41 = vector.load %arg3[%c2, %c0_17, %c0_18] : memref<9x4x1xf32, #tpu.memory_space<vmem>>, vector<1x4x1xf32>
    %42 = vector.shape_cast %41 : vector<1x4x1xf32> to vector<4x1xf32>
    %43 = vector.broadcast %42 : vector<4x1xf32> to vector<4x256xf32>
    %44 = arith.mulf %35, %43 : vector<4x256xf32>
    %cst_19 = arith.constant 0.000000e+00 : f32
    %45 = vector.shape_cast %40 : vector<1x256xi1> to vector<1x256xi1>
    %46 = vector.broadcast %45 : vector<1x256xi1> to vector<4x256xi1>
    %47 = vector.broadcast %cst_19 : f32 to vector<4x256xf32>
    %48 = arith.select %46, %44, %47 : vector<4x256xi1>, vector<4x256xf32>
    %49 = arith.addf %34, %48 : vector<4x256xf32>
    %c1_i32_20 = arith.constant 1 : i32
    %50 = tpu.dynamic_rotate %1 by %c1_i32_20 dim 1 : vector<4x256xf32>, i32 -> vector<4x256xf32>
    %c1_i32_21 = arith.constant 1 : i32
    %51 = vector.broadcast %c1_i32_21 : i32 to vector<1x256xi32>
    %52 = arith.cmpi sge, %3, %51 : vector<1x256xi32>
    %c3 = arith.constant 3 : index
    %c0_22 = arith.constant 0 : index
    %c0_23 = arith.constant 0 : index
    %53 = vector.load %arg3[%c3, %c0_22, %c0_23] : memref<9x4x1xf32, #tpu.memory_space<vmem>>, vector<1x4x1xf32>
    %54 = vector.shape_cast %53 : vector<1x4x1xf32> to vector<4x1xf32>
    %55 = vector.broadcast %54 : vector<4x1xf32> to vector<4x256xf32>
    %56 = arith.mulf %50, %55 : vector<4x256xf32>
    %cst_24 = arith.constant 0.000000e+00 : f32
    %57 = vector.shape_cast %52 : vector<1x256xi1> to vector<1x256xi1>
    %58 = vector.broadcast %57 : vector<1x256xi1> to vector<4x256xi1>
    %59 = vector.broadcast %cst_24 : f32 to vector<4x256xf32>
    %60 = arith.select %58, %56, %59 : vector<4x256xi1>, vector<4x256xf32>
    %61 = arith.addf %49, %60 : vector<4x256xf32>
    %c255_i32 = arith.constant 255 : i32
    %62 = tpu.dynamic_rotate %1 by %c255_i32 dim 1 : vector<4x256xf32>, i32 -> vector<4x256xf32>
    %c14_i32_25 = arith.constant 14 : i32
    %63 = vector.broadcast %c14_i32_25 : i32 to vector<1x256xi32>
    %64 = arith.cmpi sle, %3, %63 : vector<1x256xi32>
    %c5 = arith.constant 5 : index
    %c0_26 = arith.constant 0 : index
    %c0_27 = arith.constant 0 : index
    %65 = vector.load %arg3[%c5, %c0_26, %c0_27] : memref<9x4x1xf32, #tpu.memory_space<vmem>>, vector<1x4x1xf32>
    %66 = vector.shape_cast %65 : vector<1x4x1xf32> to vector<4x1xf32>
    %67 = vector.broadcast %66 : vector<4x1xf32> to vector<4x256xf32>
    %68 = arith.mulf %62, %67 : vector<4x256xf32>
    %cst_28 = arith.constant 0.000000e+00 : f32
    %69 = vector.shape_cast %64 : vector<1x256xi1> to vector<1x256xi1>
    %70 = vector.broadcast %69 : vector<1x256xi1> to vector<4x256xi1>
    %71 = vector.broadcast %cst_28 : f32 to vector<4x256xf32>
    %72 = arith.select %70, %68, %71 : vector<4x256xi1>, vector<4x256xf32>
    %73 = arith.addf %61, %72 : vector<4x256xf32>
    %c241_i32 = arith.constant 241 : i32
    %74 = tpu.dynamic_rotate %1 by %c241_i32 dim 1 : vector<4x256xf32>, i32 -> vector<4x256xf32>
    %c14_i32_29 = arith.constant 14 : i32
    %75 = vector.broadcast %c14_i32_29 : i32 to vector<1x256xi32>
    %76 = arith.cmpi sle, %2, %75 : vector<1x256xi32>
    %c1_i32_30 = arith.constant 1 : i32
    %77 = vector.broadcast %c1_i32_30 : i32 to vector<1x256xi32>
    %78 = arith.cmpi sge, %3, %77 : vector<1x256xi32>
    %79 = arith.andi %76, %78 : vector<1x256xi1>
    %c6 = arith.constant 6 : index
    %c0_31 = arith.constant 0 : index
    %c0_32 = arith.constant 0 : index
    %80 = vector.load %arg3[%c6, %c0_31, %c0_32] : memref<9x4x1xf32, #tpu.memory_space<vmem>>, vector<1x4x1xf32>
    %81 = vector.shape_cast %80 : vector<1x4x1xf32> to vector<4x1xf32>
    %82 = vector.broadcast %81 : vector<4x1xf32> to vector<4x256xf32>
    %83 = arith.mulf %74, %82 : vector<4x256xf32>
    %cst_33 = arith.constant 0.000000e+00 : f32
    %84 = vector.shape_cast %79 : vector<1x256xi1> to vector<1x256xi1>
    %85 = vector.broadcast %84 : vector<1x256xi1> to vector<4x256xi1>
    %86 = vector.broadcast %cst_33 : f32 to vector<4x256xf32>
    %87 = arith.select %85, %83, %86 : vector<4x256xi1>, vector<4x256xf32>
    %88 = arith.addf %73, %87 : vector<4x256xf32>
    %c240_i32 = arith.constant 240 : i32
    %89 = tpu.dynamic_rotate %1 by %c240_i32 dim 1 : vector<4x256xf32>, i32 -> vector<4x256xf32>
    %c14_i32_34 = arith.constant 14 : i32
    %90 = vector.broadcast %c14_i32_34 : i32 to vector<1x256xi32>
    %91 = arith.cmpi sle, %2, %90 : vector<1x256xi32>
    %c7 = arith.constant 7 : index
    %c0_35 = arith.constant 0 : index
    %c0_36 = arith.constant 0 : index
    %92 = vector.load %arg3[%c7, %c0_35, %c0_36] : memref<9x4x1xf32, #tpu.memory_space<vmem>>, vector<1x4x1xf32>
    %93 = vector.shape_cast %92 : vector<1x4x1xf32> to vector<4x1xf32>
    %94 = vector.broadcast %93 : vector<4x1xf32> to vector<4x256xf32>
    %95 = arith.mulf %89, %94 : vector<4x256xf32>
    %cst_37 = arith.constant 0.000000e+00 : f32
    %96 = vector.shape_cast %91 : vector<1x256xi1> to vector<1x256xi1>
    %97 = vector.broadcast %96 : vector<1x256xi1> to vector<4x256xi1>
    %98 = vector.broadcast %cst_37 : f32 to vector<4x256xf32>
    %99 = arith.select %97, %95, %98 : vector<4x256xi1>, vector<4x256xf32>
    %100 = arith.addf %88, %99 : vector<4x256xf32>
    %c239_i32 = arith.constant 239 : i32
    %101 = tpu.dynamic_rotate %1 by %c239_i32 dim 1 : vector<4x256xf32>, i32 -> vector<4x256xf32>
    %c14_i32_38 = arith.constant 14 : i32
    %102 = vector.broadcast %c14_i32_38 : i32 to vector<1x256xi32>
    %103 = arith.cmpi sle, %2, %102 : vector<1x256xi32>
    %c14_i32_39 = arith.constant 14 : i32
    %104 = vector.broadcast %c14_i32_39 : i32 to vector<1x256xi32>
    %105 = arith.cmpi sle, %3, %104 : vector<1x256xi32>
    %106 = arith.andi %103, %105 : vector<1x256xi1>
    %c8 = arith.constant 8 : index
    %c0_40 = arith.constant 0 : index
    %c0_41 = arith.constant 0 : index
    %107 = vector.load %arg3[%c8, %c0_40, %c0_41] : memref<9x4x1xf32, #tpu.memory_space<vmem>>, vector<1x4x1xf32>
    %108 = vector.shape_cast %107 : vector<1x4x1xf32> to vector<4x1xf32>
    %109 = vector.broadcast %108 : vector<4x1xf32> to vector<4x256xf32>
    %110 = arith.mulf %101, %109 : vector<4x256xf32>
    %cst_42 = arith.constant 0.000000e+00 : f32
    %111 = vector.shape_cast %106 : vector<1x256xi1> to vector<1x256xi1>
    %112 = vector.broadcast %111 : vector<1x256xi1> to vector<4x256xi1>
    %113 = vector.broadcast %cst_42 : f32 to vector<4x256xf32>
    %114 = arith.select %112, %110, %113 : vector<4x256xi1>, vector<4x256xf32>
    %115 = arith.addf %100, %114 : vector<4x256xf32>
    %c0_43 = arith.constant 0 : index
    %c0_44 = arith.constant 0 : index
    %116 = vector.load %arg4[%c0_43, %c0_44] : memref<4x1xf32, #tpu.memory_space<vmem>>, vector<4x1xf32>
    %117 = vector.broadcast %116 : vector<4x1xf32> to vector<4x256xf32>
    %118 = arith.addf %115, %117 : vector<4x256xf32>
    %cst_45 = arith.constant 0.000000e+00 : f32
    %119 = vector.broadcast %cst_45 : f32 to vector<4x256xf32>
    %120 = arith.maximumf %118, %119 : vector<4x256xf32>
    %121 = vector.extract_strided_slice %120 {offsets = [0, 0], sizes = [1, 256], strides = [1, 1]} : vector<4x256xf32> to vector<1x256xf32>
    %122 = vector.extract_strided_slice %120 {offsets = [1, 0], sizes = [1, 256], strides = [1, 1]} : vector<4x256xf32> to vector<1x256xf32>
    %123 = vector.extract_strided_slice %120 {offsets = [2, 0], sizes = [1, 256], strides = [1, 1]} : vector<4x256xf32> to vector<1x256xf32>
    %124 = vector.extract_strided_slice %120 {offsets = [3, 0], sizes = [1, 256], strides = [1, 1]} : vector<4x256xf32> to vector<1x256xf32>
    %c0_46 = arith.constant 0 : index
    %c0_47 = arith.constant 0 : index
    %125 = memref.load %arg5[%c0_46, %c0_47] : memref<4x8xf32, #tpu.memory_space<smem>>
    %126 = vector.broadcast %125 : f32 to vector<1x256xf32>
    %127 = arith.mulf %121, %126 : vector<1x256xf32>
    %c1_48 = arith.constant 1 : index
    %c0_49 = arith.constant 0 : index
    %128 = memref.load %arg5[%c1_48, %c0_49] : memref<4x8xf32, #tpu.memory_space<smem>>
    %129 = vector.broadcast %128 : f32 to vector<1x256xf32>
    %130 = arith.mulf %122, %129 : vector<1x256xf32>
    %131 = arith.addf %127, %130 : vector<1x256xf32>
    %c2_50 = arith.constant 2 : index
    %c0_51 = arith.constant 0 : index
    %132 = memref.load %arg5[%c2_50, %c0_51] : memref<4x8xf32, #tpu.memory_space<smem>>
    %133 = vector.broadcast %132 : f32 to vector<1x256xf32>
    %134 = arith.mulf %123, %133 : vector<1x256xf32>
    %135 = arith.addf %131, %134 : vector<1x256xf32>
    %c3_52 = arith.constant 3 : index
    %c0_53 = arith.constant 0 : index
    %136 = memref.load %arg5[%c3_52, %c0_53] : memref<4x8xf32, #tpu.memory_space<smem>>
    %137 = vector.broadcast %136 : f32 to vector<1x256xf32>
    %138 = arith.mulf %124, %137 : vector<1x256xf32>
    %139 = arith.addf %135, %138 : vector<1x256xf32>
    %c0_54 = arith.constant 0 : index
    %140 = memref.load %arg6[%c0_54] : memref<8xf32, #tpu.memory_space<smem>>
    %141 = vector.broadcast %140 : f32 to vector<1x256xf32>
    %142 = arith.addf %139, %141 : vector<1x256xf32>
    %cst_55 = arith.constant 0.000000e+00 : f32
    %143 = vector.broadcast %cst_55 : f32 to vector<1x256xf32>
    %144 = arith.maximumf %142, %143 : vector<1x256xf32>
    %c0_56 = arith.constant 0 : index
    %c1_57 = arith.constant 1 : index
    %145 = memref.load %arg5[%c0_56, %c1_57] : memref<4x8xf32, #tpu.memory_space<smem>>
    %146 = vector.broadcast %145 : f32 to vector<1x256xf32>
    %147 = arith.mulf %121, %146 : vector<1x256xf32>
    %c1_58 = arith.constant 1 : index
    %c1_59 = arith.constant 1 : index
    %148 = memref.load %arg5[%c1_58, %c1_59] : memref<4x8xf32, #tpu.memory_space<smem>>
    %149 = vector.broadcast %148 : f32 to vector<1x256xf32>
    %150 = arith.mulf %122, %149 : vector<1x256xf32>
    %151 = arith.addf %147, %150 : vector<1x256xf32>
    %c2_60 = arith.constant 2 : index
    %c1_61 = arith.constant 1 : index
    %152 = memref.load %arg5[%c2_60, %c1_61] : memref<4x8xf32, #tpu.memory_space<smem>>
    %153 = vector.broadcast %152 : f32 to vector<1x256xf32>
    %154 = arith.mulf %123, %153 : vector<1x256xf32>
    %155 = arith.addf %151, %154 : vector<1x256xf32>
    %c3_62 = arith.constant 3 : index
    %c1_63 = arith.constant 1 : index
    %156 = memref.load %arg5[%c3_62, %c1_63] : memref<4x8xf32, #tpu.memory_space<smem>>
    %157 = vector.broadcast %156 : f32 to vector<1x256xf32>
    %158 = arith.mulf %124, %157 : vector<1x256xf32>
    %159 = arith.addf %155, %158 : vector<1x256xf32>
    %c1_64 = arith.constant 1 : index
    %160 = memref.load %arg6[%c1_64] : memref<8xf32, #tpu.memory_space<smem>>
    %161 = vector.broadcast %160 : f32 to vector<1x256xf32>
    %162 = arith.addf %159, %161 : vector<1x256xf32>
    %cst_65 = arith.constant 0.000000e+00 : f32
    %163 = vector.broadcast %cst_65 : f32 to vector<1x256xf32>
    %164 = arith.maximumf %162, %163 : vector<1x256xf32>
    %c0_66 = arith.constant 0 : index
    %c2_67 = arith.constant 2 : index
    %165 = memref.load %arg5[%c0_66, %c2_67] : memref<4x8xf32, #tpu.memory_space<smem>>
    %166 = vector.broadcast %165 : f32 to vector<1x256xf32>
    %167 = arith.mulf %121, %166 : vector<1x256xf32>
    %c1_68 = arith.constant 1 : index
    %c2_69 = arith.constant 2 : index
    %168 = memref.load %arg5[%c1_68, %c2_69] : memref<4x8xf32, #tpu.memory_space<smem>>
    %169 = vector.broadcast %168 : f32 to vector<1x256xf32>
    %170 = arith.mulf %122, %169 : vector<1x256xf32>
    %171 = arith.addf %167, %170 : vector<1x256xf32>
    %c2_70 = arith.constant 2 : index
    %c2_71 = arith.constant 2 : index
    %172 = memref.load %arg5[%c2_70, %c2_71] : memref<4x8xf32, #tpu.memory_space<smem>>
    %173 = vector.broadcast %172 : f32 to vector<1x256xf32>
    %174 = arith.mulf %123, %173 : vector<1x256xf32>
    %175 = arith.addf %171, %174 : vector<1x256xf32>
    %c3_72 = arith.constant 3 : index
    %c2_73 = arith.constant 2 : index
    %176 = memref.load %arg5[%c3_72, %c2_73] : memref<4x8xf32, #tpu.memory_space<smem>>
    %177 = vector.broadcast %176 : f32 to vector<1x256xf32>
    %178 = arith.mulf %124, %177 : vector<1x256xf32>
    %179 = arith.addf %175, %178 : vector<1x256xf32>
    %c2_74 = arith.constant 2 : index
    %180 = memref.load %arg6[%c2_74] : memref<8xf32, #tpu.memory_space<smem>>
    %181 = vector.broadcast %180 : f32 to vector<1x256xf32>
    %182 = arith.addf %179, %181 : vector<1x256xf32>
    %cst_75 = arith.constant 0.000000e+00 : f32
    %183 = vector.broadcast %cst_75 : f32 to vector<1x256xf32>
    %184 = arith.maximumf %182, %183 : vector<1x256xf32>
    %c0_76 = arith.constant 0 : index
    %c3_77 = arith.constant 3 : index
    %185 = memref.load %arg5[%c0_76, %c3_77] : memref<4x8xf32, #tpu.memory_space<smem>>
    %186 = vector.broadcast %185 : f32 to vector<1x256xf32>
    %187 = arith.mulf %121, %186 : vector<1x256xf32>
    %c1_78 = arith.constant 1 : index
    %c3_79 = arith.constant 3 : index
    %188 = memref.load %arg5[%c1_78, %c3_79] : memref<4x8xf32, #tpu.memory_space<smem>>
    %189 = vector.broadcast %188 : f32 to vector<1x256xf32>
    %190 = arith.mulf %122, %189 : vector<1x256xf32>
    %191 = arith.addf %187, %190 : vector<1x256xf32>
    %c2_80 = arith.constant 2 : index
    %c3_81 = arith.constant 3 : index
    %192 = memref.load %arg5[%c2_80, %c3_81] : memref<4x8xf32, #tpu.memory_space<smem>>
    %193 = vector.broadcast %192 : f32 to vector<1x256xf32>
    %194 = arith.mulf %123, %193 : vector<1x256xf32>
    %195 = arith.addf %191, %194 : vector<1x256xf32>
    %c3_82 = arith.constant 3 : index
    %c3_83 = arith.constant 3 : index
    %196 = memref.load %arg5[%c3_82, %c3_83] : memref<4x8xf32, #tpu.memory_space<smem>>
    %197 = vector.broadcast %196 : f32 to vector<1x256xf32>
    %198 = arith.mulf %124, %197 : vector<1x256xf32>
    %199 = arith.addf %195, %198 : vector<1x256xf32>
    %c3_84 = arith.constant 3 : index
    %200 = memref.load %arg6[%c3_84] : memref<8xf32, #tpu.memory_space<smem>>
    %201 = vector.broadcast %200 : f32 to vector<1x256xf32>
    %202 = arith.addf %199, %201 : vector<1x256xf32>
    %cst_85 = arith.constant 0.000000e+00 : f32
    %203 = vector.broadcast %cst_85 : f32 to vector<1x256xf32>
    %204 = arith.maximumf %202, %203 : vector<1x256xf32>
    %c0_86 = arith.constant 0 : index
    %c4_87 = arith.constant 4 : index
    %205 = memref.load %arg5[%c0_86, %c4_87] : memref<4x8xf32, #tpu.memory_space<smem>>
    %206 = vector.broadcast %205 : f32 to vector<1x256xf32>
    %207 = arith.mulf %121, %206 : vector<1x256xf32>
    %c1_88 = arith.constant 1 : index
    %c4_89 = arith.constant 4 : index
    %208 = memref.load %arg5[%c1_88, %c4_89] : memref<4x8xf32, #tpu.memory_space<smem>>
    %209 = vector.broadcast %208 : f32 to vector<1x256xf32>
    %210 = arith.mulf %122, %209 : vector<1x256xf32>
    %211 = arith.addf %207, %210 : vector<1x256xf32>
    %c2_90 = arith.constant 2 : index
    %c4_91 = arith.constant 4 : index
    %212 = memref.load %arg5[%c2_90, %c4_91] : memref<4x8xf32, #tpu.memory_space<smem>>
    %213 = vector.broadcast %212 : f32 to vector<1x256xf32>
    %214 = arith.mulf %123, %213 : vector<1x256xf32>
    %215 = arith.addf %211, %214 : vector<1x256xf32>
    %c3_92 = arith.constant 3 : index
    %c4_93 = arith.constant 4 : index
    %216 = memref.load %arg5[%c3_92, %c4_93] : memref<4x8xf32, #tpu.memory_space<smem>>
    %217 = vector.broadcast %216 : f32 to vector<1x256xf32>
    %218 = arith.mulf %124, %217 : vector<1x256xf32>
    %219 = arith.addf %215, %218 : vector<1x256xf32>
    %c4_94 = arith.constant 4 : index
    %220 = memref.load %arg6[%c4_94] : memref<8xf32, #tpu.memory_space<smem>>
    %221 = vector.broadcast %220 : f32 to vector<1x256xf32>
    %222 = arith.addf %219, %221 : vector<1x256xf32>
    %cst_95 = arith.constant 0.000000e+00 : f32
    %223 = vector.broadcast %cst_95 : f32 to vector<1x256xf32>
    %224 = arith.maximumf %222, %223 : vector<1x256xf32>
    %c0_96 = arith.constant 0 : index
    %c5_97 = arith.constant 5 : index
    %225 = memref.load %arg5[%c0_96, %c5_97] : memref<4x8xf32, #tpu.memory_space<smem>>
    %226 = vector.broadcast %225 : f32 to vector<1x256xf32>
    %227 = arith.mulf %121, %226 : vector<1x256xf32>
    %c1_98 = arith.constant 1 : index
    %c5_99 = arith.constant 5 : index
    %228 = memref.load %arg5[%c1_98, %c5_99] : memref<4x8xf32, #tpu.memory_space<smem>>
    %229 = vector.broadcast %228 : f32 to vector<1x256xf32>
    %230 = arith.mulf %122, %229 : vector<1x256xf32>
    %231 = arith.addf %227, %230 : vector<1x256xf32>
    %c2_100 = arith.constant 2 : index
    %c5_101 = arith.constant 5 : index
    %232 = memref.load %arg5[%c2_100, %c5_101] : memref<4x8xf32, #tpu.memory_space<smem>>
    %233 = vector.broadcast %232 : f32 to vector<1x256xf32>
    %234 = arith.mulf %123, %233 : vector<1x256xf32>
    %235 = arith.addf %231, %234 : vector<1x256xf32>
    %c3_102 = arith.constant 3 : index
    %c5_103 = arith.constant 5 : index
    %236 = memref.load %arg5[%c3_102, %c5_103] : memref<4x8xf32, #tpu.memory_space<smem>>
    %237 = vector.broadcast %236 : f32 to vector<1x256xf32>
    %238 = arith.mulf %124, %237 : vector<1x256xf32>
    %239 = arith.addf %235, %238 : vector<1x256xf32>
    %c5_104 = arith.constant 5 : index
    %240 = memref.load %arg6[%c5_104] : memref<8xf32, #tpu.memory_space<smem>>
    %241 = vector.broadcast %240 : f32 to vector<1x256xf32>
    %242 = arith.addf %239, %241 : vector<1x256xf32>
    %cst_105 = arith.constant 0.000000e+00 : f32
    %243 = vector.broadcast %cst_105 : f32 to vector<1x256xf32>
    %244 = arith.maximumf %242, %243 : vector<1x256xf32>
    %c0_106 = arith.constant 0 : index
    %c6_107 = arith.constant 6 : index
    %245 = memref.load %arg5[%c0_106, %c6_107] : memref<4x8xf32, #tpu.memory_space<smem>>
    %246 = vector.broadcast %245 : f32 to vector<1x256xf32>
    %247 = arith.mulf %121, %246 : vector<1x256xf32>
    %c1_108 = arith.constant 1 : index
    %c6_109 = arith.constant 6 : index
    %248 = memref.load %arg5[%c1_108, %c6_109] : memref<4x8xf32, #tpu.memory_space<smem>>
    %249 = vector.broadcast %248 : f32 to vector<1x256xf32>
    %250 = arith.mulf %122, %249 : vector<1x256xf32>
    %251 = arith.addf %247, %250 : vector<1x256xf32>
    %c2_110 = arith.constant 2 : index
    %c6_111 = arith.constant 6 : index
    %252 = memref.load %arg5[%c2_110, %c6_111] : memref<4x8xf32, #tpu.memory_space<smem>>
    %253 = vector.broadcast %252 : f32 to vector<1x256xf32>
    %254 = arith.mulf %123, %253 : vector<1x256xf32>
    %255 = arith.addf %251, %254 : vector<1x256xf32>
    %c3_112 = arith.constant 3 : index
    %c6_113 = arith.constant 6 : index
    %256 = memref.load %arg5[%c3_112, %c6_113] : memref<4x8xf32, #tpu.memory_space<smem>>
    %257 = vector.broadcast %256 : f32 to vector<1x256xf32>
    %258 = arith.mulf %124, %257 : vector<1x256xf32>
    %259 = arith.addf %255, %258 : vector<1x256xf32>
    %c6_114 = arith.constant 6 : index
    %260 = memref.load %arg6[%c6_114] : memref<8xf32, #tpu.memory_space<smem>>
    %261 = vector.broadcast %260 : f32 to vector<1x256xf32>
    %262 = arith.addf %259, %261 : vector<1x256xf32>
    %cst_115 = arith.constant 0.000000e+00 : f32
    %263 = vector.broadcast %cst_115 : f32 to vector<1x256xf32>
    %264 = arith.maximumf %262, %263 : vector<1x256xf32>
    %c0_116 = arith.constant 0 : index
    %c7_117 = arith.constant 7 : index
    %265 = memref.load %arg5[%c0_116, %c7_117] : memref<4x8xf32, #tpu.memory_space<smem>>
    %266 = vector.broadcast %265 : f32 to vector<1x256xf32>
    %267 = arith.mulf %121, %266 : vector<1x256xf32>
    %c1_118 = arith.constant 1 : index
    %c7_119 = arith.constant 7 : index
    %268 = memref.load %arg5[%c1_118, %c7_119] : memref<4x8xf32, #tpu.memory_space<smem>>
    %269 = vector.broadcast %268 : f32 to vector<1x256xf32>
    %270 = arith.mulf %122, %269 : vector<1x256xf32>
    %271 = arith.addf %267, %270 : vector<1x256xf32>
    %c2_120 = arith.constant 2 : index
    %c7_121 = arith.constant 7 : index
    %272 = memref.load %arg5[%c2_120, %c7_121] : memref<4x8xf32, #tpu.memory_space<smem>>
    %273 = vector.broadcast %272 : f32 to vector<1x256xf32>
    %274 = arith.mulf %123, %273 : vector<1x256xf32>
    %275 = arith.addf %271, %274 : vector<1x256xf32>
    %c3_122 = arith.constant 3 : index
    %c7_123 = arith.constant 7 : index
    %276 = memref.load %arg5[%c3_122, %c7_123] : memref<4x8xf32, #tpu.memory_space<smem>>
    %277 = vector.broadcast %276 : f32 to vector<1x256xf32>
    %278 = arith.mulf %124, %277 : vector<1x256xf32>
    %279 = arith.addf %275, %278 : vector<1x256xf32>
    %c7_124 = arith.constant 7 : index
    %280 = memref.load %arg6[%c7_124] : memref<8xf32, #tpu.memory_space<smem>>
    %281 = vector.broadcast %280 : f32 to vector<1x256xf32>
    %282 = arith.addf %279, %281 : vector<1x256xf32>
    %cst_125 = arith.constant 0.000000e+00 : f32
    %283 = vector.broadcast %cst_125 : f32 to vector<1x256xf32>
    %284 = arith.maximumf %282, %283 : vector<1x256xf32>
    %285 = tpu.concatenate %144, %164, %184, %204, %224, %244, %264, %284 in 0 : vector<1x256xf32>, vector<1x256xf32>, vector<1x256xf32>, vector<1x256xf32>, vector<1x256xf32>, vector<1x256xf32>, vector<1x256xf32>, vector<1x256xf32> -> vector<8x256xf32>
    %c0_126 = arith.constant 0 : index
    %c0_127 = arith.constant 0 : index
    %c0_128 = arith.constant 0 : index
    %286 = vector.load %arg7[%c0_126, %c0_127, %c0_128] : memref<1x8x256xf32, #tpu.memory_space<vmem>>, vector<1x8x256xf32>
    %287 = vector.shape_cast %286 : vector<1x8x256xf32> to vector<8x256xf32>
    %288 = vector.shape_cast %285 : vector<8x256xf32> to vector<1x8x256xf32>
    tpu.vector_store %arg7[%c0_126, %c0_127, %c0_128], %288 {strides = array<i32>} : memref<1x8x256xf32, #tpu.memory_space<vmem>>, vector<1x8x256xf32>,
    return
  }
  func.func @transform_0(%arg0: i32) -> (i32, i32, i32) {
    %c0_i32 = arith.constant 0 : i32
    %c0_i32_0 = arith.constant 0 : i32
    %c0_i32_1 = arith.constant 0 : i32
    return %arg0, %c0_i32, %c0_i32_0 : i32, i32, i32
  }
  func.func @transform_1(%arg0: i32) -> (i32, i32) {
    %c0_i32 = arith.constant 0 : i32
    %c0_i32_0 = arith.constant 0 : i32
    %c0_i32_1 = arith.constant 0 : i32
    return %c0_i32, %c0_i32_0 : i32, i32
  }
  func.func @transform_2(%arg0: i32) -> (i32, i32, i32) {
    %c0_i32 = arith.constant 0 : i32
    %c0_i32_0 = arith.constant 0 : i32
    %c0_i32_1 = arith.constant 0 : i32
    %c0_i32_2 = arith.constant 0 : i32
    return %c0_i32, %c0_i32_0, %c0_i32_1 : i32, i32, i32
  }
  func.func @transform_3(%arg0: i32) -> (i32, i32) {
    %c0_i32 = arith.constant 0 : i32
    %c0_i32_0 = arith.constant 0 : i32
    %c0_i32_1 = arith.constant 0 : i32
    return %c0_i32, %c0_i32_0 : i32, i32
  }
  func.func @transform_4(%arg0: i32) -> (i32, i32) {
    %c0_i32 = arith.constant 0 : i32
    %c0_i32_0 = arith.constant 0 : i32
    %c0_i32_1 = arith.constant 0 : i32
    return %c0_i32, %c0_i32_0 : i32, i32
  }
  func.func @transform_5(%arg0: i32) -> i32 {
    %c0_i32 = arith.constant 0 : i32
    %c0_i32_0 = arith.constant 0 : i32
    return %c0_i32 : i32
  }
  func.func @transform_6(%arg0: i32) -> (i32, i32, i32) {
    %c0_i32 = arith.constant 0 : i32
    %c0_i32_0 = arith.constant 0 : i32
    %c0_i32_1 = arith.constant 0 : i32
    return %arg0, %c0_i32, %c0_i32_0 : i32, i32, i32
  }
}

</mosaic_0001>

<bundles_post_ra>
// kernel: tpu_custom_call.1
= control target key start
LH: loop header
LB: loop body
LE: loop exit
PB: predicated region body
PF: predicated region fallthrough
CT: control target
= control target key end

     0   :  { %s2042_s0 = inlined_call_operand.vmem [shape: f32[2,4,256], index: 0, kind: input, shape index: {}]   ;;  %s2043_s1 = inlined_call_operand.vmem [shape: s32[2,256], index: 1, kind: input, shape index: {}]   ;;  %s2044_s2 = inlined_call_operand.vmem [shape: f32[9,4,1], index: 2, kind: input, shape index: {}]   ;;  %s2045_s3 = inlined_call_operand.vmem [shape: f32[4,1], index: 3, kind: input, shape index: {}]   ;;  %s2046_s4 = inlined_call_operand.vmem [shape: f32[4,8], index: 4, kind: input, shape index: {}]   ;;  %s2047_s5 = inlined_call_operand.vmem [shape: f32[8], index: 5, kind: input, shape index: {}]   ;;  %s2048_s6 = inlined_call_operand.hbm [shape: f32[2,8,256], index: 6, kind: output, shape index: {}]  }
   0x1   :  { %2069 = sst [smem:[#allocation25_spill]] %s2042_s0 }
   0x2   :  { %2070 = sst [smem:[#allocation26_spill]] %s2043_s1 }
   0x3   :  { %2071 = sst [smem:[#allocation27_spill]] %s2044_s2 }
   0x4   :  { %2072 = sst [smem:[#allocation28_spill]] %s2045_s3 }
   0x5   :  { %2073 = sst [smem:[#allocation29_spill]] %s2046_s4 }
   0x6   :  { %2074 = sst [smem:[#allocation30_spill]] %s2047_s5 }
   0x7   :  { %2075 = sst [smem:[#allocation31_spill]] %s2048_s6 }
   0x8   :  { %11 = vsyncpa [#allocation4], 0 }
   0x9   :  { %12 = vsyncpa [#allocation6], 0 }
   0xa   :  { %13 = vsyncpa [#allocation3], 0 }
   0xb   :  { %15 = vsyncpa [#allocation3 + $0x1], 0  ;;  %s1360_s21 = smov 0   ;;  %s1362_s22 = smov 0  }
   0xc   :  { %s1364_s23 = smov 0   ;;  %s1366_s24 = smov 0  }
   0xd LB: > { %2076 = sst [smem:[#allocation11_spill]] %s1298_s21  ;;  %s1381_s25 = sadd.s32 4294967295, %s1310_s24   ;;  %s1310_s24 = sphi %s1366_s24, %s2155_s24   ;;  %s1306_s23 = sphi %s1364_s23, %s2158_s23   ;;  %s1302_s22 = sphi %s1362_s22, %s2157_s22   ;;  %s1298_s21 = sphi %s1360_s21, %s2156_s21  }
   0xe   : > { %2077 = sst [smem:[#allocation12_spill]] %s1302_s22  ;;  %s1050_s26 = sadd.s32 4294967294, %s1310_s24  }
   0xf   : > { %2078 = sst [smem:[#allocation13_spill]] %s1306_s23  ;;  %s1385_s27 = sadd.s32 1, %s1310_s24  }
  0x10   : > { %2079 = sst [smem:[#allocation14_spill]] %s1310_s24  ;;  %s159_s28 = sadd.s32 1, %s1306_s23 }
  0x11   : > { %2080 = sst [smem:[#allocation15_spill]] %s1381_s25  ;;  %s156_s29 = ssub.s32 %s1310_s24, %s1385_s27 }
  0x12   : > { %2081 = sst [smem:[#allocation16_spill]] %s1385_s27  ;;  %p169_p0 = scmp.ne.s32.totalorder %s1306_s23, %s1302_s22 }
  0x13   : > { %p157_p1 = scmp.eq.s32.totalorder %s156_s29, 0  ;;  %p170_p2 = scmp.eq.s32.totalorder %s1381_s25, 1 }
  0x14   : > { %p175_p3 = scmp.ne.s32.totalorder %s1302_s22, %s1298_s21  ;;  %p176_p4 = scmp.eq.s32.totalorder %s1050_s26, 1 }
  0x15   : > { %s1396_s30 = scalar_select %p157_p1, %s1306_s23, %s159_s28  }
  0x16   : > { %p1398_p5 = por %p170_p2, %p169_p0  ;;  %p1402_p6 = por %p176_p4, %p175_p3 }
  0x17   : > { %2082 = sst [smem:[#allocation17_spill]] %s1396_s30  ;;  %p1051_p7 = scmp.ge.s32.totalorder %s1310_s24, 1 }
  0x18   : > { %s2083_s7 = scalar_select %p1398_p5, 1, 0 }
  0x19   : > { %s2085_s8 = scalar_select %p1402_p6, 1, 0 }
  0x1a   : > { %2084 = sst [smem:[#allocation18_spill]] %s2083_s7  ;;  %p183_p8 = scmp.lt.s32.totalorder %s1310_s24, 3 }
  0x1b   : > { %2086 = sst [smem:[#allocation19_spill]] %s2085_s8  ;;  %p2049_p9 = scmp.eq.s32.totalorder %s1381_s25, 0 }
  0x1c   : > { %p1409_p10 = pnand %p1051_p7, %p183_p8  ;;  %s2088_s4 = sld [smem:[#allocation29_spill]] }
  0x1d   : > { %s2089_s5 = sld [smem:[#allocation30_spill]] }
  0x1e   : > { %s2087_s9 = scalar_select %p1409_p10, 1, 0 }
  0x1f   : > { %p1149_p11 = pneg %p1409_p10 }
  0x21   : > { %p1423_p12 = pnand %p2049_p9, %p1149_p11 }
  0x22   : > { %s205_s12 = sshll.u32 %s2088_s4, 4  ;;  %s206_s12 = int_to_ptr.vmem [resolvable:$true] %s205_s12 }
  0x23   : > { %s216_s15 = sshll.u32 %s2089_s5, 4  ;;  %s1212_s17 = scalar_lea.vmem %s206_s12, 64  ;;  %s217_s15 = int_to_ptr.vmem [resolvable:$true] %s216_s15 }
  0x24   : > { %p1213_p13 = scmp.ne.s32.totalorder %s206_s12, %s1212_s17  ;;  %p1214_p0 = pneg %p1423_p12 }
  0x25   : > { %p1220_p3 = scmp.lt.s32.totalorder %s206_s12, %s206_s12  ;;  %p1221_p4 = scmp.lt.s32.totalorder %s1212_s17, %s1212_s17 }
  0x26   : > { %p1215_p1 = pnand %p1214_p0, %p1213_p13 }
  0x27   : > { %p1222_p7 = por %p1221_p4, %p1220_p3 }
  0x28   : > { %p1216_p2 = pneg %p1215_p1 }
  0x2a   : > { %p1223_p8 = pnand %p1222_p7, %p1216_p2 }
  0x2c   : > { %1226 = shalt.err (!%p1223_p8)
}
  0x2d   : > { %s1312_s18 = smov [#allocation2]   ;;  %s1227_s19 = scalar_lea.vmem %s217_s15, 16 }
  0x2e   : > { %1152 = dma.vmem_to_smem (!%p1423_p12), %s206_s12, 64, %s1312_s18, [#allocation4]  }
  0x2f   : > { %p1228_p11 = scmp.ne.s32.totalorder %s217_s15, %s1227_s19  ;;  %p1235_p5 = scmp.lt.s32.totalorder %s217_s15, %s217_s15 }
  0x30   : > { %p1236_p10 = scmp.lt.s32.totalorder %s1227_s19, %s1227_s19 }
  0x31   : > { %p1230_p9 = pnand %p1228_p11, %p1214_p0 }
  0x32   : > { %p1237_p13 = por %p1236_p10, %p1235_p5 }
  0x33   : > { %p1231_p6 = pneg %p1230_p9 }
  0x35   : > { %p1238_p1 = pnand %p1237_p13, %p1231_p6 }
  0x37   : > { %1241 = shalt.err (!%p1238_p1)
}
  0x38   : > { %s1313_s20 = smov [#allocation5]   ;;  %p2091_p2 = scmp.ne.s32.totalorder %s2087_s9, 0 }
  0x39   : > { %1155 = dma.vmem_to_smem (!%p1423_p12), %s217_s15, 16, %s1313_s20, [#allocation6]  }
  0x3a   : > { %237 = sbr.rel (%p2091_p2) target bundleno = 311 (0x137), region = 44 }
  0x3f   : > { %p2092_p3 = scmp.eq.s32.totalorder %s1381_s25, 0 }
  0x41   : > { %1285 = dma.done.wait (%p2092_p3), [#allocation4], 64   ;;  %p2093_p4 = pmov %p2092_p3 }
  0x42   : > { %p2094_p9 = pmov %p2092_p3 }
  0x43   : > { %1287 = vsyncadd (%p2093_p4), [#allocation4], 4294967232 }
  0x44   : > { %1289 = dma.done.wait (%p2094_p9), [#allocation6], 16   ;;  %p2095_p5 = pmov %p2092_p3 }
  0x46   : > { %1291 = vsyncadd (%p2095_p5), [#allocation6], 4294967280 }
  0x47   : > { %247 = sfence }
  0x48   : > { %s2096_s2 = sld [smem:[#allocation27_spill]]  ;;  %p272_p6 = scmp.lt.s32.totalorder %s1381_s25, 1  ;;  %v1314_v2 = vmov 0   ;;  %v290_v21 = vlaneseq  ;;  %v1323_v26 = vmov 839922192  }
  0x49   : > { %1210 = vset.pattern.permute.xlu1 %v1314_v2  ;;  %1209 = vset.pattern.permute.xlu0 %v1314_v2  ;;  %s2097_s0 = sld [smem:[#allocation25_spill]]  ;;  %s1315_s17 = smov 17   ;;  %v288_v27 = vunpack.c.l.s4 %v1323_v26 }
  0x4a   : > { %s273_s10 = scalar_select %p272_p6, %s1381_s25, 1  ;;  %v291_v24 = vshrl.u32 %v290_v21, 7  ;;  %v1544_v32 = vand.u32 127, %v290_v21 }
  0x4b   : > { %s1316_s20 = smov 16   ;;  %s1317_s29 = smov 15   ;;  %v289_v35 = vunpack.c.0.s8 %v288_v27 }
  0x4c   : > { %s1137_s13 = sshll.u32 %s273_s10, 3  ;;  %s1318_s11 = smov 1   ;;  %v1529_v28 = vsub.s32 0, %v291_v24  ;;  %v1535_v30 = vsub.s32 1, %v291_v24  ;;  %v1566_v42 = vsub.s32 4, %v291_v24  ;;  %vm305_vm5 = vcmp.lt.s32.totalorder %v1544_v32, 17 }
  0x4d   : > { %s1319_s14 = smov 127   ;;  %s1322_s26 = smov 111   ;;  %v1580_v48 = vsub.s32 %v289_v35, %v291_v24  ;;  %vm341_vm8 = vcmp.lt.s32.totalorder %v1544_v32, 16  ;;  %vm375_vm11 = vcmp.lt.s32.totalorder %v1544_v32, 15 }
  0x4e   : > { %v1063_v0 = vld [vmem:[%s2096_s2 + $0x4] sm:$0xf]  ;;  %v311_v1 = vld [vmem:[%s2096_s2] sm:$0xf]  ;;  %v1062_v3 = vld [vmem:[%s2096_s2 + $0x10] sm:$0xf] }
  0x4f   : > { %348 = vperm.xlu1 %1210, %v1063_v0   ;;  %314 = vperm.xlu0 %1209, %v311_v1   ;;  %s276_s16 = scalar_lea.vmem %s2097_s0, %s1137_s13  ;;  %v1064_v6 = vld [vmem:[%s2096_s2 + $0x8] sm:$0xf]  ;;  %v1065_v7 = vld [vmem:[%s2096_s2 + $0xc] sm:$0xf]  ;;  %v1066_v8 = vld [vmem:[%s2096_s2 + $0x14] sm:$0xf] }
  0x50   : > { %v1459_v4 = vld [vmem:[%s276_s16] sm:$0xff]  ;;  %v1067_v9 = vld [vmem:[%s2096_s2 + $0x18] sm:$0xf]  ;;  %v1068_v10 = vld [vmem:[%s2096_s2 + $0x1c] sm:$0xf]  ;;  %s2098_s3 = sld [smem:[#allocation28_spill]] }
  0x51   : > { %v297_v5 = vcombine.high %v1459_v4, %v1459_v4  ;;  %v1069_v11 = vld [vmem:[%s2096_s2 + $0x20] sm:$0xf]  ;;  %s2099_s1 = sld [smem:[#allocation26_spill]] }
  0x52   : > { %s1523_s13 = sld [smem:[#allocation2]] }
  0x53   : > { %285 = vperm.xlu0 %1209, %v1062_v3   ;;  %299 = vrot.lane.b32.xlu1 %v1459_v4, %s1315_s17  ;;  %s1533_s15 = sld [smem:[#allocation2 + $0x100]] }
  0x54   : > { %s1542_s16 = sld [smem:[#allocation2 + $0x180]] }
  0x55   : > { %s1551_s18 = sld [smem:[#allocation2 + $0x81]] }
  0x56   : > { %v580_v12 = vld [vmem:[%s2098_s3] sm:$0xf]  ;;  %s1557_s19 = sld [smem:[#allocation2 + $0x101]] }
  0x57   : > { %301 = vrot.lane.b32.xlu0 %v297_v5, %s1315_s17  ;;  %384 = vperm.xlu1 %1210, %v1064_v6   ;;  %s1320_s17 = smov 113   ;;  %v1503_v18 = vld [vmem:[%s2099_s1] ss:$2 sm:$0x3]  ;;  %s1578_s28 = sld [smem:[#allocation2 + $0x82]] }
  0x58   : > { %v1508_v19 = vld [vmem:[%s2099_s1 + $0x1] ss:$2 sm:$0x3]  ;;  %vm308_vm0 = vcmp.ge.s32.totalorder %v1503_v18, 1  ;;  %2100 = sst [smem:[#allocation20_spill]] %s1523_s13  ;;  %vm482_vm6 = vcmp.le.s32.totalorder %v1503_v18, 14 }
  0x59   : > { %vm309_vm1 = vcmp.ge.s32.totalorder %v1508_v19, 1  ;;  %vm378_vm3 = vcmp.le.s32.totalorder %v1508_v19, 14  ;;  %2101 = sst [smem:[#allocation21_spill]] %s1533_s15  ;;  %v353_v33 = vsel %vm308_vm0, 1, %v1314_v2 }
  0x5a   : > { %vm310_vm2 = vmand %vm308_vm0, %vm309_vm1  ;;  %v357_v40 = vrot.slane %v353_v33, %v1529_v28  ;;  %v423_v41 = vsel %vm309_vm1, 1, %v1314_v2  ;;  %v361_v43 = vrot.slane %v353_v33, %v1535_v30  ;;  %v457_v47 = vsel %vm378_vm3, 1, %v1314_v2  ;;  %s1608_s9 = sld [smem:[#allocation5 + $0x1]] }
  0x5b   : > { %337 = vrot.lane.b32.xlu0 %v1459_v4, %s1316_s20  ;;  %339 = vrot.lane.b32.xlu1 %v297_v5, %s1316_s20  ;;  %s1321_s20 = smov 112   ;;  %v319_v31 = vsel %vm310_vm2, 1, %v1314_v2  ;;  %vm379_vm4 = vmand %vm308_vm0, %vm378_vm3  ;;  %v427_v50 = vrot.slane %v423_v41, %v1529_v28  ;;  %v431_v54 = vrot.slane %v423_v41, %v1535_v30  ;;  %v461_v58 = vrot.slane %v457_v47, %v1529_v28  ;;  %s1618_s10 = sld [smem:[#allocation2 + $0x102]] }
  0x5c   : > { %v323_v36 = vrot.slane %v319_v31, %v1529_v28  ;;  %v389_v37 = vsel %vm379_vm4, 1, %v1314_v2  ;;  %v327_v39 = vrot.slane %v319_v31, %v1535_v30  ;;  %vm1594_vm10 = vcmp.eq.s32.totalorder %v357_v40, 1  ;;  %vm1604_vm12 = vmand %vm482_vm6, %vm309_vm1  ;;  %s1654_s12 = sld [smem:[#allocation5 + $0x2]] }
  0x5d   : > { %v393_v44 = vrot.slane %v389_v37, %v1529_v28  ;;  %v397_v45 = vrot.slane %v389_v37, %v1535_v30  ;;  %v465_v59 = vrot.slane %v457_v47, %v1535_v30  ;;  %vm1620_vm13 = vcmp.eq.s32.totalorder %v361_v43, 1  ;;  %s1664_s0 = sld [smem:[#allocation2 + $0x3]] }
  0x5e   : > { %vm1582_vm7 = vcmp.eq.s32.totalorder %v323_v36, 1  ;;  %vm1590_vm9 = vcmp.eq.s32.totalorder %v327_v39, 1  ;;  %vm411_vm0 = vcmp.lt.s32.totalorder %v1544_v32, 1  ;;  %vm1645_vm1 = vcmp.eq.s32.totalorder %v427_v50, 1  ;;  %s1679_s1 = sld [smem:[#allocation2 + $0x83]] }
  0x5f   : > { %418 = vperm.xlu0 %1209, %v1065_v7   ;;  %371 = vrot.lane.b32.xlu1 %v1459_v4, %s1317_s29  ;;  %vm1624_vm14 = vcmp.eq.s32.totalorder %v393_v44, 1  ;;  %vm1628_vm15 = vcmp.eq.s32.totalorder %v397_v45, 1  ;;  %v1652_v6 = vsel %vm1604_vm12, 1, %v1314_v2  ;;  %vm1666_vm2 = vcmp.eq.s32.totalorder %v431_v54, 1  ;;  %vm1690_vm12 = vmand %vm482_vm6, %vm378_vm3  ;;  %s1694_s2 = sld [smem:[#allocation2 + $0x103]] }
  0x60   : > { %vm445_vm4 = vcmp.lt.s32.totalorder %v1544_v32, 127  ;;  %s1704_s3 = sld [smem:[#allocation2 + $0x183]]  ;;  %v501_v33 = vrot.slane %v1652_v6, %v1535_v30  ;;  %v562_v37 = vsel %vm1690_vm12, 1, %v1314_v2 }
  0x61   : > { %s1715_s4 = sld [smem:[#allocation5 + $0x3]]  ;;  %v566_v54 = vrot.slane %v562_v37, %v1529_v28 }
  0x62   : > { %s1726_s5 = sld [smem:[#allocation2 + $0x4]] }
  0x63   : > { %373 = vrot.lane.b32.xlu0 %v297_v5, %s1317_s29  ;;  %452 = vperm.xlu1 %1210, %v1066_v8   ;;  %s1588_s29 = sld [smem:[#allocation5]] }
  0x64   : > { %s1734_s30 = sld [smem:[#allocation2 + $0x84]] }
  0x65   : > { %s1741_s23 = sld [smem:[#allocation2 + $0x104]] }
  0x66   : > { %s1749_s27 = sld [smem:[#allocation2 + $0x184]] }
  0x67   : > { %407 = vrot.lane.b32.xlu0 %v1459_v4, %s1318_s11  ;;  %409 = vrot.lane.b32.xlu1 %v297_v5, %s1318_s11  ;;  %s1635_s11 = sld [smem:[#allocation2 + $0x182]] }
  0x68   : > { %s1754_s8 = sld [smem:[#allocation5 + $0x4]]  ;;  %v720_v60 = vstv %s1726_s5 }
  0x69   : > { %s1762_s21 = sld [smem:[#allocation2 + $0x5]] }
  0x6a   : > { %s1772_s24 = sld [smem:[#allocation2 + $0x85]]  ;;  %v723_v61 = vstv %s1734_s30 }
  0x6b   : > { %488 = vperm.xlu0 %1209, %v1067_v9   ;;  %441 = vrot.lane.b32.xlu1 %v1459_v4, %s1319_s14  ;;  %s1780_s6 = sld [smem:[#allocation2 + $0x105]] }
  0x6c   : > { %s1790_s7 = sld [smem:[#allocation2 + $0x185]] }
  0x6d   : > { %s1801_s25 = sld [smem:[#allocation5 + $0x5]] }
  0x6e   : > { %s1807_s22 = sld [smem:[#allocation2 + $0x6]] }
  0x6f   : > { %443 = vrot.lane.b32.xlu0 %v297_v5, %s1319_s14  ;;  %522 = vperm.xlu1 %1210, %v1068_v10   ;;  %s1527_s14 = sld [smem:[#allocation2 + $0x80]] }
  0x73   : > { %475 = vrot.lane.b32.xlu0 %v1459_v4, %s1320_s17  ;;  %477 = vrot.lane.b32.xlu1 %v297_v5, %s1320_s17  ;;  %s1549_s17 = sld [smem:[#allocation2 + $0x1]] }
  0x74   : > { %2137 = sst [smem:[#allocation23_spill]] %s1801_s25 }
  0x75   : > { %2138 = sst [smem:[#allocation24_spill]] %s1807_s22 }
  0x76   : > { %s1816_s25 = sld [smem:[#allocation2 + $0x86]] }
  0x77   : > { %557 = vperm.xlu0 %1209, %v1069_v11   ;;  %511 = vrot.lane.b32.xlu1 %v1459_v4, %s1321_s20  ;;  %s1820_s22 = sld [smem:[#allocation2 + $0x106]] }
  0x79   : > { %2102 = sst [smem:[#allocation22_spill]] %s1549_s17 }
  0x7b   : > { %513 = vrot.lane.b32.xlu0 %v297_v5, %s1321_s20  ;;  %545 = vrot.lane.b32.xlu1 %v1459_v4, %s1322_s26  ;;  %s1564_s20 = sld [smem:[#allocation2 + $0x181]] }
  0x7f   : > { %547 = vrot.lane.b32.xlu0 %v297_v5, %s1322_s26  ;;  %583 = vperm.xlu1 %1210, %v580_v12   ;;  %s1570_s26 = sld [smem:[#allocation2 + $0x2]] }
  0xca   : > { %v1492_v13 = vpop.permute.xlu1 %348  ;;  %v1494_v14 = vpop.permute.xlu0 %314 }
  0xce   : > { %v1496_v15 = vpop.permute.xlu0 %285  ;;  %v1498_v16 = vpop.permute.xlu1 %299 }
  0xd2   : > { %v302_v17 = vpop.permute.xlu0 %301  ;;  %v1510_v20 = vpop.permute.xlu1 %384 }
  0xd3   : > { %v306_v56 = vsel %vm305_vm5, %v1498_v16, %v302_v17  ;;  %v307_v57 = vsel %vm305_vm5, %v302_v17, %v1498_v16  ;;  %vm1671_vm5 = vcmp.eq.s32.totalorder %v461_v58, 1 }
  0xd4   : > { %v317_v7 = vmul.f32 %v1494_v14, %v307_v57  ;;  %v318_v8 = vmul.f32 %v1494_v14, %v306_v56 }
  0xd6   : > { %v1514_v22 = vpop.permute.xlu0 %337  ;;  %v1516_v23 = vpop.permute.xlu1 %339  ;;  %v330_v19 = vsel %vm1582_vm7, %v317_v7, 0.0  ;;  %v331_v31 = vsel %vm1590_vm9, %v318_v8, 0.0  ;;  %vm515_vm7 = vcmp.lt.s32.totalorder %v1544_v32, 112 }
  0xd7   : > { %v342_v0 = vsel %vm341_vm8, %v1514_v22, %v1516_v23  ;;  %v343_v1 = vsel %vm341_vm8, %v1516_v23, %v1514_v22  ;;  %vm1675_vm8 = vcmp.eq.s32.totalorder %v465_v59, 1  ;;  %v497_v22 = vrot.slane %v1652_v6, %v1529_v28 }
  0xd8   : > { %v351_v16 = vmul.f32 %v1492_v13, %v343_v1  ;;  %v352_v17 = vmul.f32 %v1492_v13, %v342_v0  ;;  %v334_v43 = vcombine.low %v330_v19, %v331_v31  ;;  %v570_v1 = vrot.slane %v562_v37, %v1535_v30 }
  0xd9   : > { %vm1764_vm3 = vcmp.eq.s32.totalorder %v497_v22, 1  ;;  %v607_v19 = vstv %s1533_s15  ;;  %s1834_s15 = sld [smem:[#allocation5 + $0x6]]  ;;  %v770_v6 = vstv %s1790_s7 }
  0xda   : > { %v1525_v25 = vpop.permute.xlu0 %418  ;;  %v1531_v29 = vpop.permute.xlu1 %371  ;;  %v364_v18 = vsel %vm1594_vm10, %v351_v16, 0.0  ;;  %v365_v39 = vsel %vm1620_vm13, %v352_v17, 0.0  ;;  %vm549_vm13 = vcmp.lt.s32.totalorder %v1544_v32, 111  ;;  %s2149_s7 = sld [smem:[#allocation31_spill]] }
  0xdb   : > { %v368_v52 = vcombine.low %v364_v18, %v365_v39 }
  0xde   : > { %v374_v34 = vpop.permute.xlu0 %373  ;;  %v1555_v38 = vpop.permute.xlu1 %452 }
  0xdf   : > { %v376_v9 = vsel %vm375_vm11, %v1531_v29, %v374_v34  ;;  %v377_v10 = vsel %vm375_vm11, %v374_v34, %v1531_v29  ;;  %vm479_vm11 = vcmp.lt.s32.totalorder %v1544_v32, 113  ;;  %v293_v34 = vrot.slane %v1496_v15, %v1580_v48 }
  0xe0   : > { %v387_v24 = vmul.f32 %v1510_v20, %v377_v10  ;;  %v388_v13 = vmul.f32 %v1510_v20, %v376_v9  ;;  %v527_v20 = vsel %vm482_vm6, 1, %v1314_v2  ;;  %vm1768_vm6 = vcmp.eq.s32.totalorder %v501_v33, 1 }
  0xe1   : > { %v535_v53 = vrot.slane %v527_v20, %v1535_v30  ;;  %v661_v32 = vstv %s1578_s28  ;;  %v793_v10 = vstv %s1820_s22 }
  0xe2   : > { %v408_v46 = vpop.permute.xlu0 %407  ;;  %v410_v51 = vpop.permute.xlu1 %409  ;;  %v400_v44 = vsel %vm1624_vm14, %v387_v24, 0.0  ;;  %v401_v2 = vsel %vm1628_vm15, %v388_v13, 0.0  ;;  %vm1797_vm14 = vcmp.eq.s32.totalorder %v566_v54, 1  ;;  %vm1811_vm15 = vcmp.eq.s32.totalorder %v570_v1, 1 }
  0xe3   : > { %v412_v26 = vsel %vm411_vm0, %v408_v46, %v410_v51  ;;  %v413_v27 = vsel %vm411_vm0, %v410_v51, %v408_v46  ;;  %v531_v46 = vrot.slane %v527_v20, %v1529_v28  ;;  %v295_v51 = vmul.f32 %v293_v34, %v1459_v4 }
  0xe4   : > { %v421_v15 = vmul.f32 %v1525_v25, %v413_v27  ;;  %v422_v40 = vmul.f32 %v1525_v25, %v412_v26  ;;  %v404_v59 = vcombine.low %v400_v44, %v401_v2  ;;  %vm1786_vm10 = vcmp.eq.s32.totalorder %v535_v53, 1 }
  0xe5   : > { %v336_v4 = vadd.f32 %v334_v43, %v295_v51  ;;  %vm1782_vm9 = vcmp.eq.s32.totalorder %v531_v46, 1  ;;  %v596_v24 = vstv %s1523_s13  ;;  %v599_v27 = vstv %s1527_s14  ;;  %s1828_s13 = sld [smem:[#allocation2 + $0x186]] }
  0xe6   : > { %v1633_v63 = vpop.permute.xlu0 %488  ;;  %v442_v5 = vpop.permute.xlu1 %441  ;;  %v435_v55 = vsel %vm1666_vm2, %v422_v40, 0.0  ;;  %v615_v20 = vstv %s1542_s16  ;;  %v627_v34 = vstv %s1549_s17  ;;  %v630_v40 = vstv %s1551_s18  ;;  %s1838_s16 = sld [smem:[#allocation2 + $0x7]] }
  0xe7   : > { %v370_v3 = vadd.f32 %v368_v52, %v336_v4  ;;  %v646_v44 = vstv %s1564_s20  ;;  %v658_v2 = vstv %s1570_s26  ;;  %s1843_s17 = sld [smem:[#allocation2 + $0x87]]  ;;  %v669_v52 = vstv %s1618_s10 }
  0xe8   : > { %s1851_s18 = sld [smem:[#allocation2 + $0x107]]  ;;  %v677_v53 = vstv %s1635_s11  ;;  %v685_v54 = vstv %s1654_s12  ;;  %v708_v4 = vstv %s1704_s3  ;;  %v747_v1 = vstv %s1754_s8 }
  0xe9   : > { %v406_v11 = vadd.f32 %v404_v59, %v370_v3  ;;  %s2141_s20 = sld [smem:[#allocation23_spill]]  ;;  %v716_v59 = vstv %s1715_s4  ;;  %v751_v3 = vstv %s1762_s21  ;;  %vm931_vm0 = vcmask 1040384  }
  0xea   : > { %v444_v21 = vpop.permute.xlu0 %443  ;;  %v1702_v29 = vpop.permute.xlu1 %522  ;;  %s2142_s26 = sld [smem:[#allocation24_spill]]  ;;  %vm937_vm2 = vcmask 1042432  }
  0xeb   : > { %v446_v35 = vsel %vm445_vm4, %v442_v5, %v444_v21  ;;  %v447_v36 = vsel %vm445_vm4, %v444_v21, %v442_v5  ;;  %s1937_s3 = sld [smem:[#allocation5 + $0x7]]  ;;  %vm940_vm4 = vcmask 1043456  }
  0xec   : > { %v455_v47 = vmul.f32 %v1555_v38, %v446_v35  ;;  %v456_v49 = vmul.f32 %v1555_v38, %v447_v36  ;;  %v434_v38 = vsel %vm1645_vm1, %v421_v15, 0.0  ;;  %vm934_vm1 = vcmask 1041408   ;;  %s2146_s4 = sld [smem:[#allocation12_spill]] }
  0xed   : > { %v438_v5 = vcombine.low %v434_v38, %v435_v55  ;;  %v689_v38 = vstv %s1664_s0  ;;  %v692_v55 = vstv %s1679_s1  ;;  %s2147_s21 = sld [smem:[#allocation15_spill]] }
  0xee   : > { %v476_v41 = vpop.permute.xlu0 %475  ;;  %v478_v45 = vpop.permute.xlu1 %477  ;;  %v468_v0 = vsel %vm1671_vm5, %v455_v47, 0.0  ;;  %vm943_vm5 = vcmask 1044480  }
  0xef   : > { %v480_v25 = vsel %vm479_vm11, %v476_v41, %v478_v45  ;;  %v481_v50 = vsel %vm479_vm11, %v478_v45, %v476_v41  ;;  %v440_v13 = vadd.f32 %v438_v5, %v406_v11  ;;  %v638_v41 = vstv %s1557_s19  ;;  %s1855_s19 = sld [smem:[#allocation2 + $0x187]] }
  0xf0   : > { %v491_v56 = vmul.f32 %v1633_v63, %v480_v25  ;;  %v492_v57 = vmul.f32 %v1633_v63, %v481_v50  ;;  %v469_v63 = vsel %vm1675_vm8, %v456_v49, 0.0  ;;  %v623_v49 = vstv %s1588_s29 }
  0xf1   : > { %v472_v12 = vcombine.low %v468_v0, %v469_v63  ;;  %v654_v25 = vstv %s1608_s9  ;;  %v739_v0 = vstv %s1749_s27  ;;  %v754_v5 = vstv %s1772_s24  ;;  %s2148_s24 = sld [smem:[#allocation18_spill]] }
  0xf2   : > { %v558_v58 = vpop.permute.xlu0 %557  ;;  %v512_v62 = vpop.permute.xlu1 %511  ;;  %v504_v8 = vsel %vm1764_vm3, %v491_v56, 0.0  ;;  %v505_v30 = vsel %vm1768_vm6, %v492_v57, 0.0  ;;  %v700_v56 = vstv %s1694_s2  ;;  %v778_v7 = vstv %s2141_s20  ;;  %s269_s5 = sand.u32 1, %s2146_s4  }
  0xf3   : > { %v508_v26 = vcombine.low %v504_v8, %v505_v30  ;;  %v474_v35 = vadd.f32 %v472_v12, %v440_v13  ;;  %v782_v8 = vstv %s2142_s26  ;;  %v801_v11 = vstv %s1828_s13  ;;  %s1138_s22 = sshll.u32 %s2147_s21, 8  ;;  %s955_s13 = scalar_lea.sflag [#allocation3], %s269_s5 }
  0xf4   : > { %v809_v12 = vstv %s1834_s15  ;;  %vm946_vm8 = vcmask 1045504   ;;  %vm949_vm11 = vcmask 1046528   ;;  %s1999_s8 = scalar_lea.hbm %s2149_s7, %s1138_s22  ;;  %s1324_s15 = smov [#allocation7]  }
  0xf5   : > { %v510_v43 = vadd.f32 %v508_v26, %v474_v35  ;;  %v832_v13 = vstv %s1855_s19 }
  0xf6   : > { %v514_v9 = vpop.permute.xlu0 %513  ;;  %v546_v22 = vpop.permute.xlu1 %545 }
  0xf7   : > { %v516_v14 = vsel %vm515_vm7, %v512_v62, %v514_v9  ;;  %v517_v16 = vsel %vm515_vm7, %v514_v9, %v512_v62  ;;  %v731_v62 = vstv %s1741_s23  ;;  %v785_v9 = vstv %s1816_s25  ;;  %p2150_p12 = scmp.ne.s32.totalorder %s2148_s24, 0 }
  0xf8   : > { %v525_v17 = vmul.f32 %v1702_v29, %v516_v14  ;;  %v526_v21 = vmul.f32 %v1702_v29, %v517_v16  ;;  %v813_v14 = vstv %s1838_s16  ;;  %v816_v16 = vstv %s1843_s17  ;;  %s1246_s17 = sshll.u32 %s1324_s15, 4  ;;  %s1247_s17 = int_to_ptr.vmem [resolvable:$false] %s1246_s17 }
  0xf9   : > { %s1248_s28 = scalar_lea.vmem %s1247_s17, 512 }
  0xfa   : > { %v538_v31 = vsel %vm1782_vm9, %v525_v17, 0.0  ;;  %v539_v29 = vsel %vm1786_vm10, %v526_v21, 0.0  ;;  %v548_v33 = vpop.permute.xlu0 %547  ;;  %v584_v47 = vpop.permute.xlu1 %583  ;;  %v824_v17 = vstv %s1851_s18 }
  0xfb   : > { %v542_v36 = vcombine.low %v538_v31, %v539_v29  ;;  %v550_v37 = vsel %vm549_vm13, %v546_v22, %v548_v33  ;;  %v551_v18 = vsel %vm549_vm13, %v548_v33, %v546_v22 }
  0xfc   : > { %v560_v39 = vmul.f32 %v558_v58, %v550_v37  ;;  %v561_v15 = vmul.f32 %v558_v58, %v551_v18  ;;  %v591_v58 = vrot.slane %v584_v47, %v1580_v48  ;;  %v762_v48 = vstv %s1780_s6  ;;  %s1058_s6 = sshll.u32 %s269_s5, 4 }
  0xfd   : > { %v544_v51 = vadd.f32 %v542_v36, %v510_v43  ;;  %s271_s23 = scalar_lea.vmem [#allocation7], %s1058_s6 }
  0xfe   : > { %v573_v45 = vsel %vm1797_vm14, %v560_v39, 0.0  ;;  %v574_v46 = vsel %vm1811_vm15, %v561_v15, 0.0  ;;  %s969_s25 = sshll.u32 %s271_s23, 4  ;;  %s2001_s25 = int_to_ptr.vmem [resolvable:$true] %s969_s25 }
  0xff   : > { %v577_v50 = vcombine.low %v573_v45, %v574_v46  ;;  %s1242_s14 = scalar_lea.vmem %s2001_s25, 256  ;;  %p1249_p8 = scmp.lt.s32.totalorder %s2001_s25, %s1247_s17 }
 0x100   : > { %p1243_p10 = scmp.ne.s32.totalorder %s2001_s25, %s1242_s14  ;;  %p1250_p11 = scmp.lt.s32.totalorder %s1248_s28, %s1242_s14 }
 0x101   : > { %v579_v57 = vadd.f32 %v577_v50, %v544_v51 }
 0x102   : > { %p1244_p0 = pnand %p1243_p10, %p2150_p12  ;;  %p1251_p13 = por %p1250_p11, %p1249_p8 }
 0x103   : > { %v593_v63 = vadd.f32 %v591_v58, %v579_v57 }
 0x104   : > { %p1245_p7 = pneg %p1244_p0 }
 0x105   : > { %v1875_v30 = vmax.f32 %v593_v63, 0.0 }
 0x106   : > { %p1252_p1 = pnand %p1251_p13, %p1245_p7 }
 0x107   : > { %v600_v21 = vmul.f32 %v599_v27, %v1875_v30  ;;  %v608_v22 = vmul.f32 %v607_v19, %v1875_v30  ;;  %v616_v23 = vmul.f32 %v615_v20, %v1875_v30  ;;  %v597_v26 = vmul.f32 %v596_v24, %v1875_v30 }
 0x108   : > { %v631_v31 = vmul.f32 %v630_v40, %v1875_v30  ;;  %v639_v29 = vmul.f32 %v638_v41, %v1875_v30  ;;  %v647_v33 = vmul.f32 %v646_v44, %v1875_v30  ;;  %v628_v27 = vmul.f32 %v627_v34, %v1875_v30 }
 0x109   : > { %v1071_v35 = vrot.slane %v600_v21, 9  ;;  %v1073_v36 = vrot.slane %v608_v22, 10  ;;  %v1075_v37 = vrot.slane %v616_v23, 11  ;;  %v659_v20 = vmul.f32 %v658_v2, %v1875_v30 }
 0x10a   : > { %v1078_v18 = vrot.slane %v631_v31, 9  ;;  %v1080_v19 = vrot.slane %v639_v29, 10  ;;  %v662_v39 = vmul.f32 %v661_v32, %v1875_v30  ;;  %v1082_v24 = vrot.slane %v647_v33, 11 }
 0x10b   : > { %v605_v15 = vadd.f32 %v1071_v35, %v597_v26  ;;  %v670_v40 = vmul.f32 %v669_v52, %v1875_v30  ;;  %v678_v41 = vmul.f32 %v677_v53, %v1875_v30  ;;  %v693_v45 = vmul.f32 %v692_v55, %v1875_v30 }
 0x10c   : > { %v636_v43 = vadd.f32 %v1078_v18, %v628_v27  ;;  %v1086_v44 = vrot.slane %v662_v39, 9  ;;  %v701_v46 = vmul.f32 %v700_v56, %v1875_v30  ;;  %v690_v50 = vmul.f32 %v689_v38, %v1875_v30 }
 0x10d   : > { %v613_v47 = vadd.f32 %v1073_v36, %v605_v15  ;;  %v1088_v34 = vrot.slane %v670_v40, 10  ;;  %v709_v2 = vmul.f32 %v708_v4, %v1875_v30  ;;  %v1090_v57 = vrot.slane %v678_v41, 11 }
 0x10e   : > { %v644_v32 = vadd.f32 %v1080_v19, %v636_v43  ;;  %v667_v51 = vadd.f32 %v1086_v44, %v659_v20  ;;  %v1094_v52 = vrot.slane %v693_v45, 9  ;;  %v1096_v53 = vrot.slane %v701_v46, 10 }
 0x10f   : > { %v621_v58 = vadd.f32 %v1075_v37, %v613_v47  ;;  %v1098_v63 = vrot.slane %v709_v2, 11  ;;  %v724_v21 = vmul.f32 %v723_v61, %v1875_v30  ;;  %v732_v23 = vmul.f32 %v731_v62, %v1875_v30 }
 0x110   : > { %v652_v55 = vadd.f32 %v1082_v24, %v644_v32  ;;  %v675_v56 = vadd.f32 %v1088_v34, %v667_v51  ;;  %v698_v22 = vadd.f32 %v1094_v52, %v690_v50  ;;  %v721_v4 = vmul.f32 %v720_v60, %v1875_v30 }
 0x111   : > { %v624_v38 = vadd.f32 %v623_v49, %v621_v58  ;;  %v1102_v26 = vrot.slane %v724_v21, 9  ;;  %v740_v31 = vmul.f32 %v739_v0, %v1875_v30  ;;  %v752_v35 = vmul.f32 %v751_v3, %v1875_v30 }
 0x112   : > { %v655_v29 = vadd.f32 %v654_v25, %v652_v55  ;;  %v683_v33 = vadd.f32 %v1090_v57, %v675_v56  ;;  %v706_v61 = vadd.f32 %v1096_v53, %v698_v22  ;;  %v1104_v37 = vrot.slane %v732_v23, 10 }
 0x113   : > { %v625_v36 = vmax.f32 %v624_v38, 0.0  ;;  %v729_v62 = vadd.f32 %v1102_v26, %v721_v4  ;;  %v755_v49 = vmul.f32 %v754_v5, %v1875_v30  ;;  %v1106_v0 = vrot.slane %v740_v31, 11 }
 0x114   : > { %v686_v60 = vadd.f32 %v685_v54, %v683_v33  ;;  %v714_v27 = vadd.f32 %v1098_v63, %v706_v61  ;;  %v763_v25 = vmul.f32 %v762_v48, %v1875_v30  ;;  %v656_v18 = vmax.f32 %v655_v29, 0.0 }
 0x115   : > { %v737_v19 = vadd.f32 %v1104_v37, %v729_v62  ;;  %v1110_v20 = vrot.slane %v755_v49, 9  ;;  %v771_v3 = vmul.f32 %v770_v6, %v1875_v30  ;;  %v783_v54 = vmul.f32 %v782_v8, %v1875_v30 }
 0x116   : > { %v687_v39 = vmax.f32 %v686_v60, 0.0  ;;  %v717_v5 = vadd.f32 %v716_v59, %v714_v27  ;;  %v786_v15 = vmul.f32 %v785_v9, %v1875_v30  ;;  %v1112_v6 = vrot.slane %v763_v25, 10 }
 0x117   : > { %v745_v48 = vadd.f32 %v1106_v0, %v737_v19  ;;  %v760_v24 = vadd.f32 %v1110_v20, %v752_v35  ;;  %v794_v40 = vmul.f32 %v793_v10, %v1875_v30  ;;  %v1114_v41 = vrot.slane %v771_v3, 11 }
 0x118   : > { %v718_v59 = vmax.f32 %v717_v5, 0.0  ;;  %v1118_v8 = vrot.slane %v786_v15, 9  ;;  %v802_v43 = vmul.f32 %v801_v11, %v1875_v30  ;;  %v814_v45 = vmul.f32 %v813_v14, %v1875_v30 }
 0x119   : > { %v748_v9 = vadd.f32 %v747_v1, %v745_v48  ;;  %v768_v44 = vadd.f32 %v1112_v6, %v760_v24  ;;  %v817_v46 = vmul.f32 %v816_v16, %v1875_v30  ;;  %v1120_v47 = vrot.slane %v794_v40, 10 }
 0x11a   : > { %v791_v10 = vadd.f32 %v1118_v8, %v783_v54  ;;  %v1122_v34 = vrot.slane %v802_v43, 11  ;;  %v825_v50 = vmul.f32 %v824_v17, %v1875_v30  ;;  %v833_v1 = vmul.f32 %v832_v13, %v1875_v30 }
 0x11b   : > { %v749_v11 = vmax.f32 %v748_v9, 0.0  ;;  %v776_v2 = vadd.f32 %v1114_v41, %v768_v44  ;;  %v1126_v32 = vrot.slane %v817_v46, 9  ;;  %v847_v51 = vrot.slane %v625_v36, %v1529_v28 }
 0x11c   : > { %v799_v14 = vadd.f32 %v1120_v47, %v791_v10  ;;  %v1128_v16 = vrot.slane %v825_v50, 10  ;;  %v851_v57 = vrot.slane %v625_v36, %v1566_v42  ;;  %v858_v58 = vrot.slane %v656_v18, %v1529_v28 }
 0x11d   : > { %v779_v52 = vadd.f32 %v778_v7, %v776_v2  ;;  %v822_v17 = vadd.f32 %v1126_v32, %v814_v45  ;;  %v862_v53 = vrot.slane %v656_v18, %v1566_v42  ;;  %v840_v21 = vstv %s1937_s3 }
 0x11e   : > { %v807_v63 = vadd.f32 %v1122_v34, %v799_v14  ;;  %v869_v30 = vrot.slane %v687_v39, %v1529_v28  ;;  %v873_v13 = vrot.slane %v687_v39, %v1566_v42  ;;  %v1130_v22 = vrot.slane %v833_v1, 11 }
 0x11f   : > { %v780_v55 = vmax.f32 %v779_v52, 0.0  ;;  %v830_v56 = vadd.f32 %v1128_v16, %v822_v17  ;;  %v880_v23 = vrot.slane %v718_v59, %v1529_v28  ;;  %v884_v38 = vrot.slane %v718_v59, %v1566_v42 }
 0x120   : > { %v810_v7 = vadd.f32 %v809_v12, %v807_v63  ;;  %v932_v4 = vsel %vm931_vm0, %v847_v51, %v858_v58  ;;  %v933_v26 = vsel %vm931_vm0, %v851_v57, %v862_v53  ;;  %v891_v29 = vrot.slane %v749_v11, %v1529_v28 }
 0x121   : > { %v838_v31 = vadd.f32 %v1130_v22, %v830_v56  ;;  %v895_v33 = vrot.slane %v749_v11, %v1566_v42  ;;  %v935_v61 = vsel %vm934_vm1, %v932_v4, %v869_v30  ;;  %v902_v36 = vrot.slane %v780_v55, %v1529_v28 }
 0x122   : > { %v811_v35 = vmax.f32 %v810_v7, 0.0  ;;  %v936_v62 = vsel %vm934_vm1, %v933_v26, %v873_v13  ;;  %v938_v12 = vsel %vm937_vm2, %v935_v61, %v880_v23  ;;  %v906_v49 = vrot.slane %v780_v55, %v1566_v42 }
 0x123   : > { %v841_v37 = vadd.f32 %v840_v21, %v838_v31  ;;  %v939_v60 = vsel %vm937_vm2, %v936_v62, %v884_v38  ;;  %v941_v27 = vsel %vm940_vm4, %v938_v12, %v891_v29 }
 0x124   : > { %v913_v0 = vrot.slane %v811_v35, %v1529_v28  ;;  %v917_v25 = vrot.slane %v811_v35, %v1566_v42  ;;  %v942_v18 = vsel %vm940_vm4, %v939_v60, %v895_v33  ;;  %v944_v19 = vsel %vm943_vm5, %v941_v27, %v902_v36 }
 0x125   : > { %v842_v20 = vmax.f32 %v841_v37, 0.0  ;;  %v945_v3 = vsel %vm943_vm5, %v942_v18, %v906_v49 }
 0x126   : > { %v947_v39 = vsel %vm946_vm8, %v944_v19, %v913_v0  ;;  %v948_v5 = vsel %vm946_vm8, %v945_v3, %v917_v25 }
 0x127   : > { %v924_v54 = vrot.slane %v842_v20, %v1529_v28  ;;  %v928_v15 = vrot.slane %v842_v20, %v1566_v42 }
 0x129   : > { %v950_v48 = vsel %vm949_vm11, %v947_v39, %v924_v54  ;;  %v951_v24 = vsel %vm949_vm11, %v948_v5, %v928_v15 }
 0x12a   : > { %952 = vst [vmem:[%s271_s23] sm:$0xff] %v950_v48  ;;  %953 = vst [vmem:[%s271_s23 + $0x8] sm:$0xff] %v951_v24 }
 0x12b   : > { %1255 = shalt.err (!%p1252_p1)
}
 0x12c   : > { %s1256_s29 = scalar_lea.hbm %s1999_s8, 256  ;;  %s1260_s11 = scalar_lea.hbm %s2149_s7, 512 }
 0x12d   : > { %p1257_p2 = scmp.ne.s32.totalorder %s1999_s8, %s1256_s29  ;;  %p1261_p9 = scmp.lt.s32.totalorder %s1999_s8, %s2149_s7 }
 0x12e   : > { %p1262_p5 = scmp.lt.s32.totalorder %s1260_s11, %s1256_s29 }
 0x12f   : > { %p1258_p3 = pnand %p1257_p2, %p2150_p12 }
 0x130   : > { %p1263_p6 = por %p1262_p5, %p1261_p9 }
 0x131   : > { %p1259_p4 = pneg %p1258_p3 }
 0x133   : > { %p1264_p10 = pnand %p1263_p6, %p1259_p4 }
 0x135   : > { %1267 = shalt.err (!%p1264_p10)
}
 0x136   : > { %1147 = dma.vmem_to_hbm [thread:$0]  (%p2150_p12), %s2001_s25, 256, %s1999_s8, %s955_s13  }
 0x137 PF: > { %s2151_s18 = sld [smem:[#allocation14_spill]] }
 0x138   : > { %s2152_s19 = sld [smem:[#allocation11_spill]] }
 0x139   : > { %s2153_s20 = sld [smem:[#allocation19_spill]] }
 0x13d   : > { %p1164_p0 = scmp.ge.s32.totalorder %s2151_s18, 2 }
 0x13e   : > { %s981_s26 = sand.u32 1, %s2152_s19  }
 0x13f   : > { %p2154_p7 = scmp.ne.s32.totalorder %s2153_s20, 0  ;;  %s982_s0 = scalar_lea.sflag [#allocation3], %s981_s26 }
 0x141   : > { %p1157_p8 = pnand %p1164_p0, %p2154_p7 }
 0x143   : > { %p1158_p11 = pneg %p1157_p8 }
 0x145   : > { %1293 = dma.done.wait (%p1158_p11), %s982_s0, 256  }
 0x146   : > { %1295 = vsyncadd (%p1158_p11), %s982_s0, 4294967040  ;;  %s2155_s24 = sld [smem:[#allocation16_spill]] }
 0x147   : > { %s2156_s21 = sld [smem:[#allocation12_spill]] }
 0x148   : > { %s2157_s22 = sld [smem:[#allocation13_spill]] }
 0x149   : > { %s2158_s23 = sld [smem:[#allocation17_spill]] }
 0x14c   : > { %p18_p13 = scmp.ge.s32.totalorder %s2155_s24, 4  }
 0x14e   :  { %20 = sbr.rel (!%p18_p13) target bundleno = 13 (0xd), region = 97 }
 0x153   :  { %987 = vsyncpa [#allocation3], 1 }
 0x154   :  { %989 = vsyncpa [#allocation3 + $0x1], 1 }
 0x155   :  { %990 = vsyncpa [#allocation4], 1 }
 0x156   :  { %992 = vsyncpa [#allocation4 + $0x1], 1 }
 0x157   :  { %993 = vsyncpa [#allocation6], 1 }

</bundles_post_ra>
